<compile_context>
chip_gen: v5e
topology: v5e:2x2
jax: 0.10.0
libtpu: 0.0.40
codegen_flags: <defaults>
</compile_context>

<pallas_src>
import math

import jax
import jax.numpy as jnp
from jax.experimental import pallas as pl
from jax.experimental.pallas import tpu as pltpu


def _round_up(x, m):
    return ((x + m - 1) // m) * m


# ---------------------------------------------------------------------------
# Kernels
# ---------------------------------------------------------------------------
def _gen_kernel_single_k(x_ref, w_ref, b_ref, o_ref):
    # Full-K contraction in one shot: no f32 accumulator revolution; the dot
    # result + bias go straight to the (lane-dense) output tile.
    acc = jnp.dot(x_ref[...], w_ref[...], preferred_element_type=jnp.float32)
    o_ref[...] = (acc + b_ref[...].astype(jnp.float32)).astype(o_ref.dtype)


def _gen_kernel_multi_k(x_ref, w_ref, b_ref, o_ref, acc_ref):
    # x_ref  : [tm, tk]    activation tile
    # w_ref  : [tk, tn]    weight tile, pre-transposed [d_model, out_size]
    # b_ref  : [1,  tn]    bias tile
    # o_ref  : [tm, tn]    output tile
    # acc_ref: [tm, tn]    f32 accumulator, resident across the k axis
    k = pl.program_id(2)

    @pl.when(k == 0)
    def _():
        acc_ref[...] = jnp.zeros_like(acc_ref)

    # RHS contracted on its sublane dim -> no XLU transpose before the MXU.
    acc_ref[...] += jnp.dot(x_ref[...], w_ref[...],
                            preferred_element_type=jnp.float32)

    @pl.when(k == pl.num_programs(2) - 1)
    def _():
        o_ref[...] = (acc_ref[...]
                      + b_ref[...].astype(jnp.float32)).astype(o_ref.dtype)


# ---------------------------------------------------------------------------
# Generator = nn.Linear(d_model, out_size):  y = x @ W^T + b
# ---------------------------------------------------------------------------
def make_generator(weight, bias, *, tm_max=512, tn_max=512):
    """weight: [out_size, d_model]; bias: [out_size].
    Returns forward(x) for x of shape [..., d_model]."""
    N, K = weight.shape
    w_dt = weight.dtype
    itemsize = jnp.dtype(w_dt).itemsize
    sub = {4: 8, 2: 16, 1: 32}.get(itemsize, 8)  # second-minor alignment

    # Generation-aware VMEM budget (~80% of per-core capacity).
    try:
        vmem_cap = int(pltpu.get_tpu_info().vmem_capacity_bytes)
    except Exception:
        vmem_cap = 64 * 1024 * 1024  # conservative (v7x per-TC)
    vmem_budget = int(0.80 * vmem_cap)

    # --- tile selection (N/K tiles are M-independent; tm picked per call) ---
    tn = min(tn_max, _round_up(N, 128))
    if N >= 256:
        tn = _round_up(tn, 256)  # 256-wide MXU alignment on v6e/v7x

    def _fits(tm_, tn_, tk_):
        dbuf = 2 * (tm_ * tk_ + tk_ * tn_ + tn_ + tm_ * tn_) * itemsize
        return dbuf + tm_ * tn_ * 4 <= vmem_budget

    tk = _round_up(K, 128)  # prefer full padded K -> 1-step k-grid
    while not _fits(tm_max, tn, tk) and tk > 512:
        tk = max(512, _round_up(tk // 2, 128))
    while not _fits(tm_max, tn, tk) and tn > 256:
        tn = max(256, tn // 2)

    K_pad = _round_up(K, tk)
    N_pad = _round_up(N, tn)

    # One-time param prep (cached across calls): transpose to [K, N] + pad.
    w_t = jnp.transpose(weight)
    if (K_pad, N_pad) != (K, N):
        w_t = jnp.pad(w_t, ((0, K_pad - K), (0, N_pad - N)))
    b2d = bias.reshape(1, N)
    if N_pad != N:
        b2d = jnp.pad(b2d, ((0, 0), (0, N_pad - N)))

    def forward(x):
        assert x.shape[-1] == K, "last dim of x must equal d_model"
        lead = x.shape[:-1]
        M = int(math.prod(lead)) if lead else 1
        dt = x.dtype

        # Bound M-padding waste for decode-shaped M; grow tm for prefill so
        # the vocab-sized weight is re-streamed fewer times.
        tm = min(tm_max, _round_up(M, sub))
        M_pad = _round_up(M, tm)

        x2d = x.reshape(M, K)
        if (M_pad, K_pad) != (M, K):
            x2d = jnp.pad(x2d, ((0, M_pad - M), (0, K_pad - K)))

        n_blocks = N_pad // tn
        m_blocks = M_pad // tm
        k_blocks = K_pad // tk

        vmem_need = (2 * (tm * tk + tk * tn + tn + tm * tn) * itemsize
                     + tm * tn * 4)
        vmem_limit = int(min(vmem_budget,
                             max(vmem_need + (4 << 20), 32 << 20)))

        # Truthful re-streaming estimate: x read once per N-tile, weight once
        # per M-tile.
        cost = pl.CostEstimate(
            flops=2 * M_pad * K_pad * N_pad,
            bytes_accessed=(n_blocks * M_pad * K_pad
                            + m_blocks * N_pad * K_pad
                            + N_pad + M_pad * N_pad) * itemsize,
            transcendentals=0,
        )

        if k_blocks == 1:
            # Full-K contraction: 2-D grid, no accumulator scratch.
            grid_spec = pltpu.PrefetchScalarGridSpec(
                num_scalar_prefetch=0,
                grid=(n_blocks, m_blocks),
                in_specs=[
                    pl.BlockSpec((tm, K_pad), lambda j, i: (i, 0)),
                    pl.BlockSpec((K_pad, tn), lambda j, i: (0, j)),
                    pl.BlockSpec((1, tn), lambda j, i: (0, j)),
                ],
                out_specs=pl.BlockSpec((tm, tn), lambda j, i: (i, j)),
            )
            kernel = _gen_kernel_single_k
            dims = ("parallel", "parallel")
        else:
            # Large d_model fallback: resident f32 accumulator across K.
            grid_spec = pltpu.PrefetchScalarGridSpec(
                num_scalar_prefetch=0,
                grid=(n_blocks, m_blocks, k_blocks),
                in_specs=[
                    pl.BlockSpec((tm, tk), lambda j, i, k: (i, k)),
                    pl.BlockSpec((tk, tn), lambda j, i, k: (k, j)),
                    pl.BlockSpec((1, tn), lambda j, i, k: (0, j)),
                ],
                out_specs=pl.BlockSpec((tm, tn), lambda j, i, k: (i, j)),
                scratch_shapes=[pltpu.VMEM((tm, tn), jnp.float32)],
            )
            kernel = _gen_kernel_multi_k
            dims = ("parallel", "parallel", "arbitrary")

        out2d = pl.pallas_call(
            kernel,
            out_shape=jax.ShapeDtypeStruct((M_pad, N_pad), dt),
            grid_spec=grid_spec,
            compiler_params=pltpu.CompilerParams(
                dimension_semantics=dims,
                vmem_limit_bytes=vmem_limit,
            ),
            cost_estimate=cost,
        )(x2d, w_t, b2d)

        out = out2d[:M, :N]
        return out.reshape(*lead, N) if lead else out.reshape(N)

    return forward


if __name__ == "__main__":
    # Small shapes consistent with a transformer generator head.
    batch, seq, d_model, out_size = 2, 8, 32, 16

    key = jax.random.PRNGKey(0)
    kx, kw, kb = jax.random.split(key, 3)

    x = jax.random.normal(kx, (batch, seq, d_model), dtype=jnp.float32)

    # Deterministic param init mimicking nn.Linear's uniform(-1/sqrt(d), 1/sqrt(d)).
    bound = 1.0 / math.sqrt(d_model)
    weight = jax.random.uniform(kw, (out_size, d_model), dtype=jnp.float32,
                                minval=-bound, maxval=bound)
    bias = jax.random.uniform(kb, (out_size,), dtype=jnp.float32,
                              minval=-bound, maxval=bound)

    # Param prep (pad + transpose) happens once, here.
    generator = make_generator(weight, bias)

    out = generator(x)
    jax.block_until_ready(out)

    # Cross-check against plain JAX reference.
    ref = x @ weight.T + bias
    assert out.shape == (batch, seq, out_size)
    assert jnp.allclose(out, ref, atol=1e-5, rtol=1e-5)

    print("KERNEL_OK")
</pallas_src>

<mosaic_0001>
module attributes {stable_mosaic.version = 11 : i64} {
  func.func @_gen_kernel_single_k(%arg0: i32, %arg1: i32, %arg2: memref<16x128xf32, #tpu.memory_space<vmem>>, %arg3: memref<128x128xf32, #tpu.memory_space<vmem>>, %arg4: memref<1x128xf32, #tpu.memory_space<vmem>>, %arg5: memref<16x128xf32, #tpu.memory_space<vmem>>) attributes {dimension_semantics = [#tpu.dimension_semantics<parallel>, #tpu.dimension_semantics<parallel>], iteration_bounds = array<i64: 1, 1>, scalar_prefetch = 0 : i64, scratch_operands = 0 : i64, tpu.core_type = #tpu.core_type<tc>, window_params = [{transform_indices = @transform_0, window_bounds = array<i64: 16, 128>}, {transform_indices = @transform_1, window_bounds = array<i64: 128, 128>}, {transform_indices = @transform_2, window_bounds = array<i64: 1, 128>}, {transform_indices = @transform_3, window_bounds = array<i64: 16, 128>}]} {
    %c0 = arith.constant 0 : index
    %c0_0 = arith.constant 0 : index
    %0 = vector.load %arg2[%c0, %c0_0] : memref<16x128xf32, #tpu.memory_space<vmem>>, vector<16x128xf32>
    %c0_1 = arith.constant 0 : index
    %c0_2 = arith.constant 0 : index
    %1 = vector.load %arg3[%c0_1, %c0_2] : memref<128x128xf32, #tpu.memory_space<vmem>>, vector<128x128xf32>
    %cst = arith.constant dense<0.000000e+00> : vector<16x128xf32>
    %2 = tpu.matmul %0, %1, %cst {dimension_numbers = #tpu.dot_dimension_numbers<[1], [0], [0], [1], [0, 0, 1, 1], [], []>} : vector<16x128xf32>, vector<128x128xf32>, vector<16x128xf32> -> vector<16x128xf32>
    %c0_3 = arith.constant 0 : index
    %c0_4 = arith.constant 0 : index
    %3 = vector.load %arg4[%c0_3, %c0_4] : memref<1x128xf32, #tpu.memory_space<vmem>>, vector<1x128xf32>
    %4 = vector.broadcast %3 : vector<1x128xf32> to vector<16x128xf32>
    %5 = arith.addf %2, %4 : vector<16x128xf32>
    %c0_5 = arith.constant 0 : index
    %c0_6 = arith.constant 0 : index
    %6 = vector.load %arg5[%c0_5, %c0_6] : memref<16x128xf32, #tpu.memory_space<vmem>>, vector<16x128xf32>
    tpu.vector_store %arg5[%c0_5, %c0_6], %5 {strides = array<i32>} : memref<16x128xf32, #tpu.memory_space<vmem>>, vector<16x128xf32>,
    return
  }
  func.func @transform_0(%arg0: i32, %arg1: i32) -> (i32, i32) {
    %c0_i32 = arith.constant 0 : i32
    %c0_i32_0 = arith.constant 0 : i32
    return %arg1, %c0_i32 : i32, i32
  }
  func.func @transform_1(%arg0: i32, %arg1: i32) -> (i32, i32) {
    %c0_i32 = arith.constant 0 : i32
    %c0_i32_0 = arith.constant 0 : i32
    return %c0_i32, %arg0 : i32, i32
  }
  func.func @transform_2(%arg0: i32, %arg1: i32) -> (i32, i32) {
    %c0_i32 = arith.constant 0 : i32
    %c0_i32_0 = arith.constant 0 : i32
    return %c0_i32, %arg0 : i32, i32
  }
  func.func @transform_3(%arg0: i32, %arg1: i32) -> (i32, i32) {
    %c0_i32 = arith.constant 0 : i32
    return %arg1, %arg0 : i32, i32
  }
}

</mosaic_0001>

<bundles_post_ra>
// kernel: tpu_custom_call.1
= control target key start
LH: loop header
LB: loop body
LE: loop exit
PB: predicated region body
PF: predicated region fallthrough
CT: control target
= control target key end

     0   :  { %8 = vsyncpa [#allocation3], 0  ;;  %s260_s0 = inlined_call_operand.hbm [shape: f32[16,128], index: 0, kind: input, shape index: {}]   ;;  %s261_s1 = inlined_call_operand.hbm [shape: f32[128,128], index: 1, kind: input, shape index: {}]   ;;  %s262_s2 = inlined_call_operand.vmem [shape: f32[1,128], index: 2, kind: input, shape index: {}]   ;;  %s263_s3 = inlined_call_operand.hbm [shape: f32[16,128], index: 3, kind: output, shape index: {}]  }
   0x1   :  { %9 = vsyncpa [#allocation6], 0 }
   0x2   :  { %10 = vsyncpa [#allocation4], 0  ;;  %s15_s14 = sshll.u32 %s260_s0, 4  ;;  %s214_s15 = smov [#allocation2]   ;;  %s16_s14 = int_to_ptr.hbm [resolvable:$true] %s15_s14 }
   0x3   :  { %s17_s16 = sshll.u32 %s214_s15, 4  ;;  %s28_s19 = sshll.u32 %s261_s1, 4  ;;  %s18_s16 = int_to_ptr.vmem [resolvable:$true] %s17_s16  ;;  %s29_s19 = int_to_ptr.hbm [resolvable:$true] %s28_s19 }
   0x4   :  { %s215_s20 = smov 128   ;;  %s216_s21 = smov 8  }
   0x5   :  { %23 = dma.hbm_to_vmem [thread:$0]  %s16_s14, 256, %s18_s16, [#allocation3], %s215_s20, %s215_s20, %s216_s21  }
   0x6   :  { %s217_s22 = smov [#allocation5]  }
   0x7   :  { %s30_s23 = sshll.u32 %s217_s22, 4  ;;  %s31_s23 = int_to_ptr.vmem [resolvable:$true] %s30_s23 }
   0x8   :  { %36 = dma.hbm_to_vmem [thread:$0]  %s29_s19, 2048, %s31_s23, [#allocation6], %s215_s20, %s215_s20, %s216_s21  }
   0x9   :  { %208 = dma.done.wait [#allocation3], 256  }
   0xa   :  { %209 = vsyncadd [#allocation3], 4294967040 }
   0xb   :  { %210 = dma.done.wait [#allocation6], 2048  }
   0xc   :  { %211 = vsyncadd [#allocation6], 4294965248  ;;  %v64_v0 = vld [vmem:[#allocation5 + $0x78] sm:$0xff]  ;;  %v63_v1 = vld [vmem:[#allocation5 + $0x70] sm:$0xff]  ;;  %s218_s24 = smov [#allocation7]   ;;  %s100_s28 = sshll.u32 %s263_s3, 4  ;;  %s101_s28 = int_to_ptr.hbm [resolvable:$true] %s100_s28 }
   0xd   :  { %69 = vmatpush.msra.mxu0 %v64_v0  ;;  %114 = vmatpush.msra.mxu1 %v64_v0  ;;  %v62_v2 = vld [vmem:[#allocation5 + $0x68] sm:$0xff]  ;;  %v61_v3 = vld [vmem:[#allocation5 + $0x60] sm:$0xff]  ;;  %v60_v4 = vld [vmem:[#allocation5 + $0x58] sm:$0xff]  ;;  %s98_s25 = sshll.u32 %s218_s24, 4  ;;  %s99_s25 = int_to_ptr.vmem [resolvable:$true] %s98_s25 }
   0xe   :  { %v59_v5 = vld [vmem:[#allocation5 + $0x50] sm:$0xff]  ;;  %v58_v6 = vld [vmem:[#allocation5 + $0x48] sm:$0xff]  ;;  %v57_v7 = vld [vmem:[#allocation5 + $0x40] sm:$0xff] }
   0xf   :  { %70 = vmatpush.msra.mxu0 %v63_v1  ;;  %115 = vmatpush.msra.mxu1 %v63_v1  ;;  %v56_v8 = vld [vmem:[#allocation5 + $0x38] sm:$0xff]  ;;  %v55_v9 = vld [vmem:[#allocation5 + $0x30] sm:$0xff]  ;;  %v54_v10 = vld [vmem:[#allocation5 + $0x28] sm:$0xff] }
  0x10   :  { %v53_v11 = vld [vmem:[#allocation5 + $0x20] sm:$0xff]  ;;  %v52_v12 = vld [vmem:[#allocation5 + $0x18] sm:$0xff]  ;;  %v51_v13 = vld [vmem:[#allocation5 + $0x10] sm:$0xff] }
  0x11   :  { %71 = vmatpush.msra.mxu0 %v62_v2  ;;  %116 = vmatpush.msra.mxu1 %v62_v2  ;;  %v50_v14 = vld [vmem:[#allocation5 + $0x8] sm:$0xff]  ;;  %v49_v15 = vld [vmem:[#allocation5] sm:$0xff]  ;;  %v47_v16 = vld [vmem:[#allocation2] sm:$0xff] }
  0x12   :  { %v48_v17 = vld [vmem:[#allocation2 + $0x8] sm:$0xff]  ;;  %v135_v18 = vld [vmem:[%s262_s2] ss:$0 sm:$0xff] }
  0x13   :  { %72 = vmatpush.msra.mxu0 %v61_v3  ;;  %117 = vmatpush.msra.mxu1 %v61_v3 }
  0x15   :  { %73 = vmatpush.msra.mxu0 %v60_v4  ;;  %118 = vmatpush.msra.mxu1 %v60_v4 }
  0x17   :  { %74 = vmatpush.msra.mxu0 %v59_v5  ;;  %119 = vmatpush.msra.mxu1 %v59_v5 }
  0x19   :  { %75 = vmatpush.msra.mxu0 %v58_v6  ;;  %120 = vmatpush.msra.mxu1 %v58_v6 }
  0x1b   :  { %76 = vmatpush.msra.mxu0 %v57_v7  ;;  %121 = vmatpush.msra.mxu1 %v57_v7 }
  0x1d   :  { %77 = vmatpush.msra.mxu0 %v56_v8  ;;  %122 = vmatpush.msra.mxu1 %v56_v8 }
  0x1f   :  { %78 = vmatpush.msra.mxu0 %v55_v9  ;;  %123 = vmatpush.msra.mxu1 %v55_v9 }
  0x21   :  { %79 = vmatpush.msra.mxu0 %v54_v10  ;;  %124 = vmatpush.msra.mxu1 %v54_v10 }
  0x23   :  { %80 = vmatpush.msra.mxu0 %v53_v11  ;;  %125 = vmatpush.msra.mxu1 %v53_v11 }
  0x25   :  { %81 = vmatpush.msra.mxu0 %v52_v12  ;;  %126 = vmatpush.msra.mxu1 %v52_v12 }
  0x27   :  { %82 = vmatpush.msra.mxu0 %v51_v13  ;;  %127 = vmatpush.msra.mxu1 %v51_v13 }
  0x29   :  { %83 = vmatpush.msra.mxu0 %v50_v14  ;;  %128 = vmatpush.msra.mxu1 %v50_v14 }
  0x2b   :  { %84 = vmatpush.msra.mxu0 %v49_v15  ;;  %129 = vmatpush.msra.mxu1 %v49_v15 }
  0x2c   :  { %85 = vmatmul.f32.vlgmr.msra.gmra.mxu0 %v47_v16  ;;  %88 = vmatmul.f32.vlgmr.msra.gmra.mxu1 %v48_v17 }
  0xa9   :  { %v86_v19 = vpop.f32.mrf.mxu0  ;;  %v89_v20 = vpop.f32.mrf.mxu1 }
  0xaa   :  { %v87_v21 = vadd.f32 %v135_v18, %v86_v19  ;;  %v90_v22 = vadd.f32 %v135_v18, %v89_v20 }
  0xac   :  { %92 = vst [vmem:[#allocation7] sm:$0xff] %v87_v21 }
  0xad   :  { %93 = vst [vmem:[#allocation7 + $0x8] sm:$0xff] %v90_v22 }
  0xae   :  { %106 = dma.vmem_to_hbm [thread:$0]  %s99_s25, 256, %s101_s28, [#allocation4], %s215_s20, %s215_s20, %s216_s21  }
  0xaf   :  { %212 = dma.done.wait [#allocation4], 256  }
  0xb0   :  { %213 = vsyncadd [#allocation4], 4294967040 }
  0xb1   :  { %111 = vsyncpa [#allocation3], 1 }
  0xb2   :  { %112 = vsyncpa [#allocation6], 1 }
  0xb3   :  { %113 = vsyncpa [#allocation4], 1 }

</bundles_post_ra>
